<compile_context>
chip_gen: v7x
topology: tpu7x:2x2x1
jax: 0.10.0
libtpu: 0.0.40
codegen_flags: <defaults>
</compile_context>

<pallas_src>
import functools

import jax
import jax.numpy as jnp
from jax.experimental import pallas as pl
from jax.experimental.pallas import tpu as pltpu

LANE = 128  # TPU lane width


def _round_up(a, b):
    return ((a + b - 1) // b) * b


def dnn2_kernel(x_ref, w1_ref, b1_ref, w2_ref, b2_ref, w3_ref, b3_ref, o_ref):
    # x arrives f32; cast to bf16 on the VPU (massive slack) so the MXU runs
    # bf16 operands with f32 accumulation. Bias + ReLU stay in f32 (v5e has
    # no bf16 VPU path).
    x = x_ref[...].astype(jnp.bfloat16)
    # Layer 1: Linear(F -> 128) + bias + ReLU.
    h1 = jnp.dot(x, w1_ref[...], preferred_element_type=jnp.float32)
    h1 = jnp.maximum(h1 + b1_ref[...], 0.0)
    # Layer 2: Linear(128 -> 128_padded) + bias + ReLU (cols 64..127 are zero).
    h2 = jnp.dot(h1.astype(jnp.bfloat16), w2_ref[...],
                 preferred_element_type=jnp.float32)
    h2 = jnp.maximum(h2 + b2_ref[...], 0.0)
    # Layer 3: Linear(128_padded -> O) + bias, no activation.
    y = jnp.dot(h2.astype(jnp.bfloat16), w3_ref[...],
                preferred_element_type=jnp.float32)
    o_ref[...] = (y + b3_ref[...]).astype(o_ref.dtype)


def prepare_params(w1, b1, w2, b2, w3, b3):
    """One-time parameter prep (call once, outside the per-step forward):
      * zero-pad the hidden dim H2 (64 -> 128) on w2 cols / b2 / w3 rows so
        layer-2 N and layer-3 K are lane-dense; result is numerically
        unchanged (padded h2 columns are relu(0)=0, padded w3 rows are 0).
      * weights -> bf16 (MXU operands), biases -> f32 (VPU bias/ReLU).
    """
    H2 = w2.shape[1]
    H2P = _round_up(H2, LANE)
    if H2P != H2:
        w2 = jnp.pad(w2, ((0, 0), (0, H2P - H2)))
        b2 = jnp.pad(b2, ((0, 0), (0, H2P - H2)))
        w3 = jnp.pad(w3, ((0, H2P - H2), (0, 0)))
    return (w1.astype(jnp.bfloat16), b1.astype(jnp.float32),
            w2.astype(jnp.bfloat16), b2.astype(jnp.float32),
            w3.astype(jnp.bfloat16), b3.astype(jnp.float32))


@functools.partial(jax.jit, static_argnames=("block_b",))
def dnn2_forward(x, w1, b1, w2, b2, w3, b3, *, block_b=1024):
    """x: (B, F) f32; params as returned by prepare_params().
    Returns (B, O) float32."""
    B, F = x.shape
    H1 = w1.shape[1]
    H2 = w2.shape[1]          # already lane-padded by prepare_params
    O = w3.shape[1]

    # Batch tile: as big as block_b allows, but keep at least 2 grid steps so
    # both v7x TensorCores get work; always a multiple of 8 (sublanes).
    TB = min(block_b, max(8, _round_up(pl.cdiv(B, 2), 8)))
    BP = _round_up(B, TB)
    if BP != B:
        x = jnp.pad(x, ((0, BP - B), (0, 0)))
    grid = (BP // TB,)

    flops = 2 * BP * (F * H1 + H1 * H2 + H2 * O)
    bytes_accessed = (BP * F * 4                       # x (f32 in)
                      + (w1.size + w2.size + w3.size) * 2
                      + (b1.size + b2.size + b3.size) * 4
                      + BP * O * 4)                    # y (f32 out, O wide)

    y = pl.pallas_call(
        dnn2_kernel,
        out_shape=jax.ShapeDtypeStruct((BP, O), jnp.float32),
        grid=grid,
        in_specs=[
            pl.BlockSpec((TB, F), lambda i: (i, 0)),   # x tile, per grid step
            pl.BlockSpec((F, H1), lambda i: (0, 0)),   # weights / biases stay
            pl.BlockSpec((1, H1), lambda i: (0, 0)),   # VMEM-resident across
            pl.BlockSpec((H1, H2), lambda i: (0, 0)),  # the whole grid
            pl.BlockSpec((1, H2), lambda i: (0, 0)),
            pl.BlockSpec((H2, O), lambda i: (0, 0)),
            pl.BlockSpec((1, O), lambda i: (0, 0)),
        ],
        out_specs=pl.BlockSpec((TB, O), lambda i: (i, 0)),
        compiler_params=pltpu.CompilerParams(
            dimension_semantics=("parallel",)),        # megacore on v7x
        cost_estimate=pl.CostEstimate(flops=flops, transcendentals=0,
                                      bytes_accessed=bytes_accessed),
    )(x, w1, b1, w2, b2, w3, b3)

    if BP != B:
        y = y[:B]
    return y


def init_params(key, inputs, outputs, dtype=jnp.float32):
    """Deterministic synthetic init (PyTorch-like uniform fan-in scaling).
    Hidden widths 128 and 64 are fixed by the DNN2 module."""
    h1, h2 = 128, 64
    k1, k2, k3, k4, k5, k6 = jax.random.split(key, 6)
    l1 = 1.0 / (inputs ** 0.5)
    l2 = 1.0 / (h1 ** 0.5)
    l3 = 1.0 / (h2 ** 0.5)
    # Stored pre-transposed: (in, out)
    w1 = jax.random.uniform(k1, (inputs, h1), dtype, -l1, l1)
    b1 = jax.random.uniform(k2, (1, h1), dtype, -l1, l1)
    w2 = jax.random.uniform(k3, (h1, h2), dtype, -l2, l2)
    b2 = jax.random.uniform(k4, (1, h2), dtype, -l2, l2)
    w3 = jax.random.uniform(k5, (h2, outputs), dtype, -l3, l3)
    b3 = jax.random.uniform(k6, (1, outputs), dtype, -l3, l3)
    return w1, b1, w2, b2, w3, b3


if __name__ == "__main__":
    key = jax.random.PRNGKey(0)
    kx, kp = jax.random.split(key)

    B, INPUTS, OUTPUTS = 512, 32, 16        # hidden widths 128/64 fixed by DNN2
    x = jax.random.normal(kx, (B, INPUTS), jnp.float32)
    w1, b1, w2, b2, w3, b3 = init_params(kp, INPUTS, OUTPUTS)

    # One-time parameter prep (outside the per-step forward).
    params = prepare_params(w1, b1, w2, b2, w3, b3)

    y = dnn2_forward(x, *params, block_b=1024)
    y = jax.block_until_ready(y)

    # Pure-JAX reference on the ORIGINAL (unpadded) weights, same bf16-operand
    # / f32-accumulate recipe as the kernel.
    xb = x.astype(jnp.bfloat16)
    h1 = jnp.maximum(
        jnp.dot(xb, w1.astype(jnp.bfloat16),
                preferred_element_type=jnp.float32) + b1, 0.0)
    h2 = jnp.maximum(
        jnp.dot(h1.astype(jnp.bfloat16), w2.astype(jnp.bfloat16),
                preferred_element_type=jnp.float32) + b2, 0.0)
    y_ref = jnp.dot(h2.astype(jnp.bfloat16), w3.astype(jnp.bfloat16),
                    preferred_element_type=jnp.float32) + b3

    assert y.shape == (B, OUTPUTS)
    assert jnp.allclose(y, y_ref, atol=1e-3, rtol=1e-3)

    print("KERNEL_OK")
</pallas_src>

<mosaic_0001>
module attributes {stable_mosaic.version = 11 : i64} {
  func.func @dnn2_kernel(%arg0: i32, %arg1: memref<256x32xf32, #tpu.memory_space<vmem>>, %arg2: memref<32x128xbf16, #tpu.memory_space<vmem>>, %arg3: memref<1x128xf32, #tpu.memory_space<vmem>>, %arg4: memref<128x128xbf16, #tpu.memory_space<vmem>>, %arg5: memref<1x128xf32, #tpu.memory_space<vmem>>, %arg6: memref<128x16xbf16, #tpu.memory_space<vmem>>, %arg7: memref<1x16xf32, #tpu.memory_space<vmem>>, %arg8: memref<256x16xf32, #tpu.memory_space<vmem>>) attributes {dimension_semantics = [#tpu.dimension_semantics<parallel>], iteration_bounds = array<i64: 2>, scalar_prefetch = 0 : i64, scratch_operands = 0 : i64, tpu.core_type = #tpu.core_type<tc>, window_params = [{transform_indices = @transform_0, window_bounds = array<i64: 256, 32>}, {pipeline_mode = #tpu.pipeline_mode<synchronous>, transform_indices = @transform_1, window_bounds = array<i64: 32, 128>}, {pipeline_mode = #tpu.pipeline_mode<synchronous>, transform_indices = @transform_2, window_bounds = array<i64: 1, 128>}, {pipeline_mode = #tpu.pipeline_mode<synchronous>, transform_indices = @transform_3, window_bounds = array<i64: 128, 128>}, {pipeline_mode = #tpu.pipeline_mode<synchronous>, transform_indices = @transform_4, window_bounds = array<i64: 1, 128>}, {pipeline_mode = #tpu.pipeline_mode<synchronous>, transform_indices = @transform_5, window_bounds = array<i64: 128, 16>}, {pipeline_mode = #tpu.pipeline_mode<synchronous>, transform_indices = @transform_6, window_bounds = array<i64: 1, 16>}, {transform_indices = @transform_7, window_bounds = array<i64: 256, 16>}]} {
    %c0 = arith.constant 0 : index
    %c0_0 = arith.constant 0 : index
    %0 = vector.load %arg1[%c0, %c0_0] : memref<256x32xf32, #tpu.memory_space<vmem>>, vector<256x32xf32>
    %1 = arith.truncf %0 : vector<256x32xf32> to vector<256x32xbf16>
    %c0_1 = arith.constant 0 : index
    %c0_2 = arith.constant 0 : index
    %2 = vector.load %arg2[%c0_1, %c0_2] : memref<32x128xbf16, #tpu.memory_space<vmem>>, vector<32x128xbf16>
    %cst = arith.constant dense<0.000000e+00> : vector<256x128xf32>
    %3 = tpu.matmul %1, %2, %cst {dimension_numbers = #tpu.dot_dimension_numbers<[1], [0], [0], [1], [0, 0, 1, 1], [], []>} : vector<256x32xbf16>, vector<32x128xbf16>, vector<256x128xf32> -> vector<256x128xf32>
    %c0_3 = arith.constant 0 : index
    %c0_4 = arith.constant 0 : index
    %4 = vector.load %arg3[%c0_3, %c0_4] : memref<1x128xf32, #tpu.memory_space<vmem>>, vector<1x128xf32>
    %5 = vector.broadcast %4 : vector<1x128xf32> to vector<256x128xf32>
    %6 = arith.addf %3, %5 : vector<256x128xf32>
    %cst_5 = arith.constant 0.000000e+00 : f32
    %7 = vector.broadcast %cst_5 : f32 to vector<256x128xf32>
    %8 = arith.maximumf %6, %7 : vector<256x128xf32>
    %9 = arith.truncf %8 : vector<256x128xf32> to vector<256x128xbf16>
    %c0_6 = arith.constant 0 : index
    %c0_7 = arith.constant 0 : index
    %10 = vector.load %arg4[%c0_6, %c0_7] : memref<128x128xbf16, #tpu.memory_space<vmem>>, vector<128x128xbf16>
    %cst_8 = arith.constant dense<0.000000e+00> : vector<256x128xf32>
    %11 = tpu.matmul %9, %10, %cst_8 {dimension_numbers = #tpu.dot_dimension_numbers<[1], [0], [0], [1], [0, 0, 1, 1], [], []>} : vector<256x128xbf16>, vector<128x128xbf16>, vector<256x128xf32> -> vector<256x128xf32>
    %c0_9 = arith.constant 0 : index
    %c0_10 = arith.constant 0 : index
    %12 = vector.load %arg5[%c0_9, %c0_10] : memref<1x128xf32, #tpu.memory_space<vmem>>, vector<1x128xf32>
    %13 = vector.broadcast %12 : vector<1x128xf32> to vector<256x128xf32>
    %14 = arith.addf %11, %13 : vector<256x128xf32>
    %cst_11 = arith.constant 0.000000e+00 : f32
    %15 = vector.broadcast %cst_11 : f32 to vector<256x128xf32>
    %16 = arith.maximumf %14, %15 : vector<256x128xf32>
    %17 = arith.truncf %16 : vector<256x128xf32> to vector<256x128xbf16>
    %c0_12 = arith.constant 0 : index
    %c0_13 = arith.constant 0 : index
    %18 = vector.load %arg6[%c0_12, %c0_13] : memref<128x16xbf16, #tpu.memory_space<vmem>>, vector<128x16xbf16>
    %cst_14 = arith.constant dense<0.000000e+00> : vector<256x16xf32>
    %19 = tpu.matmul %17, %18, %cst_14 {dimension_numbers = #tpu.dot_dimension_numbers<[1], [0], [0], [1], [0, 0, 1, 1], [], []>} : vector<256x128xbf16>, vector<128x16xbf16>, vector<256x16xf32> -> vector<256x16xf32>
    %c0_15 = arith.constant 0 : index
    %c0_16 = arith.constant 0 : index
    %20 = vector.load %arg7[%c0_15, %c0_16] : memref<1x16xf32, #tpu.memory_space<vmem>>, vector<1x16xf32>
    %21 = vector.broadcast %20 : vector<1x16xf32> to vector<256x16xf32>
    %22 = arith.addf %19, %21 : vector<256x16xf32>
    %c0_17 = arith.constant 0 : index
    %c0_18 = arith.constant 0 : index
    %23 = vector.load %arg8[%c0_17, %c0_18] : memref<256x16xf32, #tpu.memory_space<vmem>>, vector<256x16xf32>
    tpu.vector_store %arg8[%c0_17, %c0_18], %22 {strides = array<i32>} : memref<256x16xf32, #tpu.memory_space<vmem>>, vector<256x16xf32>,
    return
  }
  func.func @transform_0(%arg0: i32) -> (i32, i32) {
    %c0_i32 = arith.constant 0 : i32
    %c0_i32_0 = arith.constant 0 : i32
    return %arg0, %c0_i32 : i32, i32
  }
  func.func @transform_1(%arg0: i32) -> (i32, i32) {
    %c0_i32 = arith.constant 0 : i32
    %c0_i32_0 = arith.constant 0 : i32
    %c0_i32_1 = arith.constant 0 : i32
    return %c0_i32, %c0_i32_0 : i32, i32
  }
  func.func @transform_2(%arg0: i32) -> (i32, i32) {
    %c0_i32 = arith.constant 0 : i32
    %c0_i32_0 = arith.constant 0 : i32
    %c0_i32_1 = arith.constant 0 : i32
    return %c0_i32, %c0_i32_0 : i32, i32
  }
  func.func @transform_3(%arg0: i32) -> (i32, i32) {
    %c0_i32 = arith.constant 0 : i32
    %c0_i32_0 = arith.constant 0 : i32
    %c0_i32_1 = arith.constant 0 : i32
    return %c0_i32, %c0_i32_0 : i32, i32
  }
  func.func @transform_4(%arg0: i32) -> (i32, i32) {
    %c0_i32 = arith.constant 0 : i32
    %c0_i32_0 = arith.constant 0 : i32
    %c0_i32_1 = arith.constant 0 : i32
    return %c0_i32, %c0_i32_0 : i32, i32
  }
  func.func @transform_5(%arg0: i32) -> (i32, i32) {
    %c0_i32 = arith.constant 0 : i32
    %c0_i32_0 = arith.constant 0 : i32
    %c0_i32_1 = arith.constant 0 : i32
    return %c0_i32, %c0_i32_0 : i32, i32
  }
  func.func @transform_6(%arg0: i32) -> (i32, i32) {
    %c0_i32 = arith.constant 0 : i32
    %c0_i32_0 = arith.constant 0 : i32
    %c0_i32_1 = arith.constant 0 : i32
    return %c0_i32, %c0_i32_0 : i32, i32
  }
  func.func @transform_7(%arg0: i32) -> (i32, i32) {
    %c0_i32 = arith.constant 0 : i32
    %c0_i32_0 = arith.constant 0 : i32
    return %arg0, %c0_i32 : i32, i32
  }
}

</mosaic_0001>

<bundles_post_ra>
// kernel: dnn2_forward.1
= control target key start
LH: loop header
LB: loop body
LE: loop exit
PB: predicated region body
PF: predicated region fallthrough
CT: control target
= control target key end

     0   :  { %s1537_s24 = smov 0   ;;  %s1848_s0 = inlined_call_operand.vmem [shape: f32[512,32], index: 0, kind: input, shape index: {}]   ;;  %s1849_s1 = inlined_call_operand.vmem [shape: bf16[32,128], index: 1, kind: input, shape index: {}]   ;;  %s1850_s2 = inlined_call_operand.vmem [shape: f32[1,128], index: 2, kind: input, shape index: {}]   ;;  %s1851_s3 = inlined_call_operand.vmem [shape: bf16[128,128], index: 3, kind: input, shape index: {}]   ;;  %s1852_s4 = inlined_call_operand.vmem [shape: f32[1,128], index: 4, kind: input, shape index: {}]   ;;  %s1853_s5 = inlined_call_operand.vmem [shape: bf16[128,16], index: 5, kind: input, shape index: {}]   ;;  %s1854_s6 = inlined_call_operand.vmem [shape: f32[1,16], index: 6, kind: input, shape index: {}]   ;;  %s1855_s7 = inlined_call_operand.vmem [shape: f32[512,16], index: 7, kind: output, shape index: {}]  }
   0x1 LB: > { %s1213_s25 = sadd.s32 4294967295, %s1495_s24   ;;  %p1217_p0 = scmp.ge.s32.totalorder %s1495_s24, 1  ;;  %s1495_s24 = sphi %s1537_s24, %s17_s24  }
   0x2   : > { %p238_p1 = scmp.lt.s32.totalorder %s1495_s24, 3 }
   0x4   : > { %p239_p2 = pnand %p1217_p0, %p238_p1 }
   0x5   : > { %v1471_v0 = vld [vmem:[%s1849_s1] sm:$0xff] (!%p239_p2)   ;;  %s1218_s28 = sshll.u32 (!%p239_p2), %s1213_s25, 5  ;;  %v1472_v1 = vld [vmem:[%s1849_s1 + $0x8] sm:$0xff] (!%p239_p2)   ;;  %vm354_vm0 = vcmask (!%p239_p2), 261120   ;;  %v1475_v29 = vld [vmem:[%s1851_s3 + $0x10] sm:$0xff] (!%p239_p2)   ;;  %vm1124_vm1 = vcmask (!%p239_p2), 130048  }
   0x6   : > { %242 = sbr.rel (%p239_p2) target bundleno = 738 (0x2e2), region = 48  ;;  %p271_p3 = scmp.lt.s32.totalorder (!%p239_p2), %s1218_s28, 63  ;;  %1327 = vmatprep.subr.bf16.mxu0 (!%p239_p2), %v1471_v0  ;;  %1459 = vmatprep.subr.bf16.mxu1 (!%p239_p2), %v1471_v0  ;;  %v1473_v2 = vld [vmem:[%s1851_s3] sm:$0xff] (!%p239_p2)   ;;  %v1474_v24 = vld [vmem:[%s1851_s3 + $0x8] sm:$0xff] (!%p239_p2)   ;;  %v1476_v38 = vld [vmem:[%s1851_s3 + $0x18] sm:$0xff] (!%p239_p2)  }
   0x7   : > { %1328 = vmatpush3.bf16.msra.mxu0 (!%p239_p2), %v1471_v0  ;;  %1461 = vmatpush3.bf16.msra.mxu1 (!%p239_p2), %v1471_v0  ;;  %v1477_v46 = vld [vmem:[%s1851_s3 + $0x20] sm:$0xff] (!%p239_p2)   ;;  %v1478_v51 = vld [vmem:[%s1851_s3 + $0x28] sm:$0xff] (!%p239_p2)   ;;  %v1479_v56 = vld [vmem:[%s1851_s3 + $0x30] sm:$0xff] (!%p239_p2)  }
   0x8   : > { %1329 = vmatprep.subr.bf16.mxu0 (!%p239_p2), %v1472_v1  ;;  %1460 = vmatprep.subr.bf16.mxu1 (!%p239_p2), %v1472_v1  ;;  %v1480_v57 = vld [vmem:[%s1851_s3 + $0x38] sm:$0xff] (!%p239_p2)   ;;  %v1481_v58 = vld [vmem:[%s1853_s5] sm:$0xff] (!%p239_p2)   ;;  %v1482_v59 = vld [vmem:[%s1853_s5 + $0x8] sm:$0xff] (!%p239_p2)  }
   0x9   : > { %v1483_v60 = vld [vmem:[%s1853_s5 + $0x10] sm:$0xff] (!%p239_p2)   ;;  %v1484_v61 = vld [vmem:[%s1853_s5 + $0x18] sm:$0xff] (!%p239_p2)   ;;  %v1485_v62 = vld [vmem:[%s1853_s5 + $0x20] sm:$0xff] (!%p239_p2)  }
   0xa   : > { %v1486_v63 = vld [vmem:[%s1853_s5 + $0x28] sm:$0xff] (!%p239_p2)   ;;  %v1654_v0 = vld [vmem:[%s1850_s2] ss:$0 sm:$0xff] (!%p239_p2) }
   0xb   : > { %1330 = vmatpush3.bf16.msra.mxu0 (!%p239_p2), %v1472_v1  ;;  %1462 = vmatpush3.bf16.msra.mxu1 (!%p239_p2), %v1472_v1 }
   0xc   : > { %1363 = vmatprep.subr.bf16.mxu1 (!%p239_p2), %v1473_v2  ;;  %1411 = vmatprep.subr.bf16.mxu0 (!%p239_p2), %v1481_v58 }
   0xd   : > { %s1857_s28 = smov (!%p271_p3, %s1218_s28), 63 }
   0xe   : > { %s1219_s10 = sshll.u32 %s1857_s28, 3 }
   0xf   : > { %s1562_s13 = scalar_lea.vmem %s1848_s0, %s1219_s10  ;;  %s1747_s12 = scalar_lea.vmem %s1855_s7, %s1219_s10 }
  0x10   : > { %v283_v3 = vld [vmem:[%s1562_s13] sm:$0xff]  ;;  %v284_v4 = vld [vmem:[%s1562_s13 + $0x8] sm:$0xff]  ;;  %v285_v5 = vld [vmem:[%s1562_s13 + $0x10] sm:$0xff] }
  0x11   : > { %v315_v6 = vpack.c.bf16 %v284_v4, %v283_v3  ;;  %v286_v7 = vld [vmem:[%s1562_s13 + $0x18] sm:$0xff]  ;;  %v287_v8 = vld [vmem:[%s1562_s13 + $0x20] sm:$0xff]  ;;  %v288_v9 = vld [vmem:[%s1562_s13 + $0x28] sm:$0xff] }
  0x12   : > { %v316_v10 = vpack.c.bf16 %v286_v7, %v285_v5  ;;  %v317_v11 = vpack.c.bf16 %v288_v9, %v287_v8  ;;  %v289_v12 = vld [vmem:[%s1562_s13 + $0x30] sm:$0xff]  ;;  %v290_v13 = vld [vmem:[%s1562_s13 + $0x38] sm:$0xff]  ;;  %v291_v14 = vld [vmem:[%s1562_s13 + $0x40] sm:$0xff] }
  0x13   : > { %1331 = vmatprep.mubr.msk.bf16.mxu0 %vm354_vm0, %v315_v6  ;;  %v292_v15 = vld [vmem:[%s1562_s13 + $0x48] sm:$0xff]  ;;  %v299_v16 = vld [vmem:[%s1562_s13 + $0x80] sm:$0xff]  ;;  %v301_v19 = vld [vmem:[%s1562_s13 + $0x90] sm:$0xff]  ;;  %v318_v25 = vpack.c.bf16 %v290_v13, %v289_v12 }
  0x14   : > { %1332 = vmatmul.mubr.msk.bf16.vlgmr.msra.gmra.mrb[0].mxu0 %vm354_vm0, %v316_v10  ;;  %v300_v17 = vld [vmem:[%s1562_s13 + $0x88] sm:$0xff]  ;;  %v302_v20 = vld [vmem:[%s1562_s13 + $0x98] sm:$0xff]  ;;  %v303_v21 = vld [vmem:[%s1562_s13 + $0xa0] sm:$0xff]  ;;  %v319_v27 = vpack.c.bf16 %v292_v15, %v291_v14 }
  0x15   : > { %1335 = vmatprep.mubr.msk.bf16.mxu0 %vm354_vm0, %v317_v11  ;;  %v323_v18 = vpack.c.bf16 %v300_v17, %v299_v16  ;;  %v324_v22 = vpack.c.bf16 %v302_v20, %v301_v19  ;;  %v304_v23 = vld [vmem:[%s1562_s13 + $0xa8] sm:$0xff]  ;;  %v305_v28 = vld [vmem:[%s1562_s13 + $0xb0] sm:$0xff]  ;;  %v306_v30 = vld [vmem:[%s1562_s13 + $0xb8] sm:$0xff]  ;;  %1412 = vmatpush3.bf16.msra.mxu0 %v1481_v58 }
  0x16   : > { %v325_v26 = vpack.c.bf16 %v304_v23, %v303_v21  ;;  %v307_v31 = vld [vmem:[%s1562_s13 + $0xc0] sm:$0xff]  ;;  %v293_v32 = vld [vmem:[%s1562_s13 + $0x50] sm:$0xff]  ;;  %v294_v33 = vld [vmem:[%s1562_s13 + $0x58] sm:$0xff]  ;;  %v326_v37 = vpack.c.bf16 %v306_v30, %v305_v28  ;;  %1413 = vmatprep.subr.bf16.mxu0 %v1482_v59 }
  0x17   : > { %1347 = vmatprep.mubr.msk.bf16.mxu1 %vm354_vm0, %v323_v18  ;;  %v308_v34 = vld [vmem:[%s1562_s13 + $0xc8] sm:$0xff]  ;;  %v295_v35 = vld [vmem:[%s1562_s13 + $0x60] sm:$0xff]  ;;  %v320_v40 = vpack.c.bf16 %v294_v33, %v293_v32  ;;  %v309_v42 = vld [vmem:[%s1562_s13 + $0xd0] sm:$0xff] }
  0x18   : > { %1348 = vmatmul.mubr.msk.bf16.vlgmr.msra.gmra.mrb[0].mxu1 %vm354_vm0, %v324_v22  ;;  %v296_v36 = vld [vmem:[%s1562_s13 + $0x68] sm:$0xff]  ;;  %v327_v39 = vpack.c.bf16 %v308_v34, %v307_v31  ;;  %v310_v43 = vld [vmem:[%s1562_s13 + $0xd8] sm:$0xff]  ;;  %v311_v44 = vld [vmem:[%s1562_s13 + $0xe0] sm:$0xff] }
  0x19   : > { %1351 = vmatprep.mubr.msk.bf16.mxu1 %vm354_vm0, %v325_v26  ;;  %1364 = vmatpush3.bf16.msra.mxu1 %v1473_v2  ;;  %v321_v41 = vpack.c.bf16 %v296_v36, %v295_v35  ;;  %v312_v45 = vld [vmem:[%s1562_s13 + $0xe8] sm:$0xff]  ;;  %v297_v47 = vld [vmem:[%s1562_s13 + $0x70] sm:$0xff]  ;;  %v298_v48 = vld [vmem:[%s1562_s13 + $0x78] sm:$0xff]  ;;  %v328_v49 = vpack.c.bf16 %v310_v43, %v309_v42 }
  0x1a   : > { %1365 = vmatprep.subr.bf16.mxu1 %v1474_v24  ;;  %v329_v50 = vpack.c.bf16 %v312_v45, %v311_v44  ;;  %v322_v52 = vpack.c.bf16 %v298_v48, %v297_v47  ;;  %v313_v53 = vld [vmem:[%s1562_s13 + $0xf0] sm:$0xff]  ;;  %v314_v54 = vld [vmem:[%s1562_s13 + $0xf8] sm:$0xff]  ;;  %1414 = vmatpush3.bf16.msra.mxu0 %v1482_v59 }
  0x1b   : > { %v330_v55 = vpack.c.bf16 %v314_v54, %v313_v53  ;;  %1415 = vmatprep.subr.bf16.mxu0 %v1483_v60 }
  0x1c   : > { %1336 = vmatmul.mubr.msk.bf16.gmra.mrb[4].mxu0 %vm354_vm0, %v318_v25 }
  0x1d   : > { %1339 = vmatprep.mubr.msk.bf16.mxu0 %vm354_vm0, %v319_v27  ;;  %1366 = vmatpush3.bf16.msra.mxu1 %v1474_v24 }
  0x1e   : > { %1367 = vmatprep.subr.bf16.mxu1 %v1475_v29  ;;  %1416 = vmatpush3.bf16.msra.mxu0 %v1483_v60 }
  0x1f   : > { %1417 = vmatprep.subr.bf16.mxu0 %v1484_v61 }
  0x20   : > { %1352 = vmatmul.mubr.msk.bf16.gmra.mrb[4].mxu1 %vm354_vm0, %v326_v37 }
  0x21   : > { %1355 = vmatprep.mubr.msk.bf16.mxu1 %vm354_vm0, %v327_v39  ;;  %1368 = vmatpush3.bf16.msra.mxu1 %v1475_v29 }
  0x22   : > { %1369 = vmatprep.subr.bf16.mxu1 %v1476_v38  ;;  %1418 = vmatpush3.bf16.msra.mxu0 %v1484_v61 }
  0x23   : > { %1419 = vmatprep.subr.bf16.mxu0 %v1485_v62 }
  0x24   : > { %1340 = vmatmul.mubr.msk.bf16.gmra.mrb[8].mxu0 %vm354_vm0, %v320_v40 }
  0x25   : > { %1343 = vmatprep.mubr.msk.bf16.mxu0 %vm354_vm0, %v321_v41  ;;  %1370 = vmatpush3.bf16.msra.mxu1 %v1476_v38 }
  0x26   : > { %1371 = vmatprep.subr.bf16.mxu1 %v1477_v46  ;;  %1420 = vmatpush3.bf16.msra.mxu0 %v1485_v62 }
  0x27   : > { %1421 = vmatprep.subr.bf16.mxu0 %v1486_v63 }
  0x28   : > { %1356 = vmatmul.mubr.msk.bf16.gmra.mrb[8].mxu1 %vm354_vm0, %v328_v49 }
  0x29   : > { %1359 = vmatprep.mubr.msk.bf16.mxu1 %vm354_vm0, %v329_v50  ;;  %1372 = vmatpush3.bf16.msra.mxu1 %v1477_v46 }
  0x2a   : > { %1373 = vmatprep.subr.bf16.mxu1 %v1478_v51  ;;  %1422 = vmatpush3.bf16.msra.mxu0 %v1486_v63 }
  0x2c   : > { %1344 = vmatmul.mubr.msk.bf16.gmra.mrb[12].mxu0 %vm354_vm0, %v322_v52 }
  0x2d   : > { %1374 = vmatpush3.bf16.msra.mxu1 %v1478_v51 }
  0x2e   : > { %1375 = vmatprep.subr.bf16.mxu1 %v1479_v56 }
  0x30   : > { %1360 = vmatmul.mubr.msk.bf16.gmra.mrb[12].mxu1 %vm354_vm0, %v330_v55 }
  0x31   : > { %1376 = vmatpush3.bf16.msra.mxu1 %v1479_v56 }
  0x32   : > { %1377 = vmatprep.subr.bf16.mxu1 %v1480_v57 }
  0x35   : > { %1378 = vmatpush3.bf16.msra.mxu1 %v1480_v57 }
  0xe7   : > { %v1333_v1 = vpop.f32.mrb[0].mxu0 }
  0xe8   : > { %v446_v2 = vadd.f32 %v1333_v1, %v1654_v0  ;;  %v437_v3 = vpop.f32.mrb[1].mxu0 }
  0xe9   : > { %v438_v4 = vadd.f32 %v1654_v0, %v437_v3  ;;  %v1334_v5 = vpop.f32.mrb[2].mxu0 }
  0xea   : > { %v449_v6 = vadd.f32 %v1334_v5, %v1654_v0  ;;  %v440_v7 = vpop.f32.mrb[3].mxu0  ;;  %v566_v9 = vmax.f32 %v446_v2, 0.0 }
  0xeb   : > { %v441_v8 = vadd.f32 %v1654_v0, %v440_v7  ;;  %v1349_v11 = vpop.f32.mrb[0].mxu1  ;;  %v564_v12 = vmax.f32 %v438_v4, 0.0 }
  0xec   : > { %v567_v10 = vmax.f32 %v449_v6, 0.0  ;;  %v510_v14 = vadd.f32 %v1349_v11, %v1654_v0  ;;  %v501_v15 = vpop.f32.mrb[1].mxu1 }
  0xed   : > { %v565_v13 = vmax.f32 %v441_v8, 0.0  ;;  %v502_v17 = vadd.f32 %v1654_v0, %v501_v15  ;;  %v1350_v18 = vpop.f32.mrb[2].mxu1 }
  0xee   : > { %v597_v16 = vpack.c.bf16 %v567_v10, %v566_v9  ;;  %v582_v21 = vmax.f32 %v510_v14, 0.0  ;;  %v513_v22 = vadd.f32 %v1350_v18, %v1654_v0  ;;  %v504_v23 = vpop.f32.mrb[3].mxu1 }
  0xef   : > { %v596_v19 = vpack.c.bf16 %v565_v13, %v564_v12  ;;  %v1337_v20 = vpop.f32.mrb[4].mxu0  ;;  %v580_v26 = vmax.f32 %v502_v17, 0.0  ;;  %v505_v27 = vadd.f32 %v1654_v0, %v504_v23 }
  0xf0   : > { %v462_v24 = vadd.f32 %v1337_v20, %v1654_v0  ;;  %v453_v25 = vpop.f32.mrb[5].mxu0  ;;  %v583_v30 = vmax.f32 %v513_v22, 0.0 }
  0xf1   : > { %v454_v28 = vadd.f32 %v1654_v0, %v453_v25  ;;  %v1338_v29 = vpop.f32.mrb[6].mxu0  ;;  %1379 = vmatprep.mubr.bf16.mxu1 %v596_v19  ;;  %v581_v33 = vmax.f32 %v505_v27, 0.0 }
  0xf2   : > { %v465_v31 = vadd.f32 %v1338_v29, %v1654_v0  ;;  %v456_v32 = vpop.f32.mrb[7].mxu0  ;;  %1380 = vmatmul.mubr.bf16.vlgmr.msra.gmra.mrb[16].mxu1 %v597_v16  ;;  %v1668_v35 = vpack.c.bf16 %v583_v30, %v582_v21  ;;  %v570_v36 = vmax.f32 %v462_v24, 0.0 }
  0xf3   : > { %v457_v34 = vadd.f32 %v1654_v0, %v456_v32  ;;  %v1670_v38 = vpack.c.bf16 %v581_v33, %v580_v26  ;;  %v1353_v39 = vpop.f32.mrb[4].mxu1  ;;  %v568_v40 = vmax.f32 %v454_v28, 0.0 }
  0xf4   : > { %v571_v37 = vmax.f32 %v465_v31, 0.0  ;;  %v526_v42 = vadd.f32 %v1353_v39, %v1654_v0  ;;  %v517_v43 = vpop.f32.mrb[5].mxu1 }
  0xf5   : > { %v569_v41 = vmax.f32 %v457_v34, 0.0  ;;  %v518_v45 = vadd.f32 %v1654_v0, %v517_v43  ;;  %v1354_v46 = vpop.f32.mrb[6].mxu1 }
  0xf6   : > { %v599_v44 = vpack.c.bf16 %v571_v37, %v570_v36  ;;  %v586_v49 = vmax.f32 %v526_v42, 0.0  ;;  %v529_v50 = vadd.f32 %v1354_v46, %v1654_v0  ;;  %v520_v51 = vpop.f32.mrb[7].mxu1 }
  0xf7   : > { %v598_v47 = vpack.c.bf16 %v569_v41, %v568_v40  ;;  %v1341_v48 = vpop.f32.mrb[8].mxu0  ;;  %v584_v54 = vmax.f32 %v518_v45, 0.0  ;;  %v521_v55 = vadd.f32 %v1654_v0, %v520_v51 }
  0xf8   : > { %v478_v52 = vadd.f32 %v1341_v48, %v1654_v0  ;;  %v469_v53 = vpop.f32.mrb[9].mxu0  ;;  %v587_v58 = vmax.f32 %v529_v50, 0.0 }
  0xf9   : > { %v470_v56 = vadd.f32 %v1654_v0, %v469_v53  ;;  %v1342_v57 = vpop.f32.mrb[10].mxu0  ;;  %1383 = vmatprep.mubr.bf16.mxu1 %v598_v47  ;;  %v585_v61 = vmax.f32 %v521_v55, 0.0 }
  0xfa   : > { %v481_v59 = vadd.f32 %v1342_v57, %v1654_v0  ;;  %v472_v60 = vpop.f32.mrb[11].mxu0  ;;  %1384 = vmatmul.mubr.bf16.gmra.mrb[20].mxu1 %v599_v44  ;;  %v607_v63 = vpack.c.bf16 %v587_v58, %v586_v49  ;;  %v574_v1 = vmax.f32 %v478_v52, 0.0 }
  0xfb   : > { %v473_v62 = vadd.f32 %v1654_v0, %v472_v60  ;;  %v606_v3 = vpack.c.bf16 %v585_v61, %v584_v54  ;;  %v1357_v4 = vpop.f32.mrb[8].mxu1  ;;  %v572_v5 = vmax.f32 %v470_v56, 0.0 }
  0xfc   : > { %v575_v2 = vmax.f32 %v481_v59, 0.0  ;;  %v542_v7 = vadd.f32 %v1357_v4, %v1654_v0  ;;  %v533_v8 = vpop.f32.mrb[9].mxu1 }
  0xfd   : > { %v573_v6 = vmax.f32 %v473_v62, 0.0  ;;  %v534_v10 = vadd.f32 %v1654_v0, %v533_v8  ;;  %v1358_v11 = vpop.f32.mrb[10].mxu1 }
  0xfe   : > { %v601_v9 = vpack.c.bf16 %v575_v2, %v574_v1  ;;  %v590_v14 = vmax.f32 %v542_v7, 0.0  ;;  %v545_v15 = vadd.f32 %v1358_v11, %v1654_v0  ;;  %v536_v16 = vpop.f32.mrb[11].mxu1 }
  0xff   : > { %v600_v12 = vpack.c.bf16 %v573_v6, %v572_v5  ;;  %v1345_v13 = vpop.f32.mrb[12].mxu0  ;;  %v588_v19 = vmax.f32 %v534_v10, 0.0  ;;  %v537_v20 = vadd.f32 %v1654_v0, %v536_v16 }
 0x100   : > { %v494_v17 = vadd.f32 %v1345_v13, %v1654_v0  ;;  %v485_v18 = vpop.f32.mrb[13].mxu0  ;;  %v591_v23 = vmax.f32 %v545_v15, 0.0 }
 0x101   : > { %v486_v21 = vadd.f32 %v1654_v0, %v485_v18  ;;  %v1346_v22 = vpop.f32.mrb[14].mxu0  ;;  %1387 = vmatprep.mubr.bf16.mxu1 %v600_v12  ;;  %v589_v26 = vmax.f32 %v537_v20, 0.0 }
 0x102   : > { %v497_v24 = vadd.f32 %v1346_v22, %v1654_v0  ;;  %v488_v25 = vpop.f32.mrb[15].mxu0  ;;  %1388 = vmatmul.mubr.bf16.gmra.mrb[24].mxu1 %v601_v9  ;;  %v609_v28 = vpack.c.bf16 %v591_v23, %v590_v14  ;;  %v578_v29 = vmax.f32 %v494_v17, 0.0 }
 0x103   : > { %v489_v27 = vadd.f32 %v1654_v0, %v488_v25  ;;  %v608_v31 = vpack.c.bf16 %v589_v26, %v588_v19  ;;  %v1361_v32 = vpop.f32.mrb[12].mxu1  ;;  %v576_v33 = vmax.f32 %v486_v21, 0.0 }
 0x104   : > { %v579_v30 = vmax.f32 %v497_v24, 0.0  ;;  %v558_v36 = vadd.f32 %v1361_v32, %v1654_v0  ;;  %v549_v37 = vpop.f32.mrb[13].mxu1 }
 0x105   : > { %v577_v34 = vmax.f32 %v489_v27, 0.0  ;;  %v550_v40 = vadd.f32 %v1654_v0, %v549_v37  ;;  %v1362_v41 = vpop.f32.mrb[14].mxu1 }
 0x106   : > { %v603_v39 = vpack.c.bf16 %v579_v30, %v578_v29  ;;  %v594_v43 = vmax.f32 %v558_v36, 0.0  ;;  %v561_v44 = vadd.f32 %v1362_v41, %v1654_v0  ;;  %v552_v45 = vpop.f32.mrb[15].mxu1 }
 0x107   : > { %v602_v42 = vpack.c.bf16 %v577_v34, %v576_v33  ;;  %v592_v46 = vmax.f32 %v550_v40, 0.0  ;;  %v553_v47 = vadd.f32 %v1654_v0, %v552_v45  ;;  %v1487_v0 = vld [vmem:[%s1853_s5 + $0x30] sm:$0xff]  }
 0x108   : > { %v595_v48 = vmax.f32 %v561_v44, 0.0  ;;  %1423 = vmatprep.subr.bf16.mxu0 %v1487_v0 }
 0x109   : > { %1391 = vmatprep.mubr.bf16.mxu1 %v602_v42  ;;  %v593_v49 = vmax.f32 %v553_v47, 0.0  ;;  %1424 = vmatpush3.bf16.msra.mxu0 %v1487_v0 }
 0x10a   : > { %1392 = vmatmul.mubr.bf16.gmra.mrb[28].mxu1 %v603_v39  ;;  %v611_v50 = vpack.c.bf16 %v595_v48, %v594_v43 }
 0x10b   : > { %1395 = vmatprep.mubr.bf16.mxu1 %v1670_v38  ;;  %v610_v51 = vpack.c.bf16 %v593_v49, %v592_v46  ;;  %v1488_v38 = vld [vmem:[%s1853_s5 + $0x38] sm:$0xff]  }
 0x10c   : > { %1425 = vmatprep.subr.bf16.mxu0 %v1488_v38 }
 0x10d   : > { %1426 = vmatpush3.bf16.msra.mxu0 %v1488_v38 }
 0x112   : > { %1396 = vmatmul.mubr.bf16.gmra.mrb[32].mxu1 %v1668_v35  ;;  %v1703_v35 = vld [vmem:[%s1852_s4] ss:$0 sm:$0xff] }
 0x113   : > { %1399 = vmatprep.mubr.bf16.mxu1 %v606_v3 }
 0x11a   : > { %1400 = vmatmul.mubr.bf16.gmra.mrb[36].mxu1 %v607_v63 }
 0x11b   : > { %1403 = vmatprep.mubr.bf16.mxu1 %v608_v31 }
 0x122   : > { %1404 = vmatmul.mubr.bf16.gmra.mrb[40].mxu1 %v609_v28 }
 0x123   : > { %1407 = vmatprep.mubr.bf16.mxu1 %v610_v51 }
 0x12a   : > { %1408 = vmatmul.mubr.bf16.gmra.mrb[44].mxu1 %v611_v50 }
 0x1c5   : > { %v1381_v52 = vpop.f32.mrb[16].mxu1 }
 0x1c6   : > { %v726_v53 = vadd.f32 %v1381_v52, %v1703_v35  ;;  %v717_v54 = vpop.f32.mrb[17].mxu1 }
 0x1c7   : > { %v718_v55 = vadd.f32 %v1703_v35, %v717_v54  ;;  %v1382_v56 = vpop.f32.mrb[18].mxu1 }
 0x1c8   : > { %v729_v57 = vadd.f32 %v1382_v56, %v1703_v35  ;;  %v720_v58 = vpop.f32.mrb[19].mxu1  ;;  %v846_v60 = vmax.f32 %v726_v53, 0.0 }
 0x1c9   : > { %v721_v59 = vadd.f32 %v1703_v35, %v720_v58  ;;  %v844_v62 = vmax.f32 %v718_v55, 0.0 }
 0x1ca   : > { %v847_v61 = vmax.f32 %v729_v57, 0.0 }
 0x1cb   : > { %v845_v63 = vmax.f32 %v721_v59, 0.0 }
 0x1cc   : > { %v877_v1 = vpack.c.bf16 %v847_v61, %v846_v60 }
 0x1cd   : > { %v876_v2 = vpack.c.bf16 %v845_v63, %v844_v62  ;;  %v1385_v3 = vpop.f32.mrb[20].mxu1 }
 0x1ce   : > { %v742_v4 = vadd.f32 %v1385_v3, %v1703_v35  ;;  %v733_v5 = vpop.f32.mrb[21].mxu1 }
 0x1cf   : > { %v734_v6 = vadd.f32 %v1703_v35, %v733_v5  ;;  %v1386_v7 = vpop.f32.mrb[22].mxu1  ;;  %1427 = vmatprep.mubr.bf16.mxu0 %v876_v2 }
 0x1d0   : > { %v745_v8 = vadd.f32 %v1386_v7, %v1703_v35  ;;  %v736_v9 = vpop.f32.mrb[23].mxu1  ;;  %1428 = vmatmul.mubr.bf16.vlgmr.msra.gmra.mrb[16].mxu0 %v877_v1  ;;  %v850_v11 = vmax.f32 %v742_v4, 0.0 }
 0x1d1   : > { %v737_v10 = vadd.f32 %v1703_v35, %v736_v9  ;;  %v848_v13 = vmax.f32 %v734_v6, 0.0 }
 0x1d2   : > { %v851_v12 = vmax.f32 %v745_v8, 0.0 }
 0x1d3   : > { %v849_v14 = vmax.f32 %v737_v10, 0.0 }
 0x1d4   : > { %v879_v15 = vpack.c.bf16 %v851_v12, %v850_v11 }
 0x1d5   : > { %v878_v16 = vpack.c.bf16 %v849_v14, %v848_v13  ;;  %v1389_v17 = vpop.f32.mrb[24].mxu1 }
 0x1d6   : > { %v758_v18 = vadd.f32 %v1389_v17, %v1703_v35  ;;  %v749_v19 = vpop.f32.mrb[25].mxu1 }
 0x1d7   : > { %v750_v20 = vadd.f32 %v1703_v35, %v749_v19  ;;  %v1390_v21 = vpop.f32.mrb[26].mxu1  ;;  %1431 = vmatprep.mubr.bf16.mxu0 %v878_v16 }
 0x1d8   : > { %v761_v22 = vadd.f32 %v1390_v21, %v1703_v35  ;;  %v752_v23 = vpop.f32.mrb[27].mxu1  ;;  %1432 = vmatmul.mubr.bf16.gmra.mrb[20].mxu0 %v879_v15  ;;  %v854_v25 = vmax.f32 %v758_v18, 0.0 }
 0x1d9   : > { %v753_v24 = vadd.f32 %v1703_v35, %v752_v23  ;;  %v852_v27 = vmax.f32 %v750_v20, 0.0 }
 0x1da   : > { %v855_v26 = vmax.f32 %v761_v22, 0.0 }
 0x1db   : > { %v853_v28 = vmax.f32 %v753_v24, 0.0 }
 0x1dc   : > { %v881_v29 = vpack.c.bf16 %v855_v26, %v854_v25 }
 0x1dd   : > { %v880_v30 = vpack.c.bf16 %v853_v28, %v852_v27  ;;  %v1393_v31 = vpop.f32.mrb[28].mxu1 }
 0x1de   : > { %v774_v32 = vadd.f32 %v1393_v31, %v1703_v35  ;;  %v765_v33 = vpop.f32.mrb[29].mxu1 }
 0x1df   : > { %v766_v34 = vadd.f32 %v1703_v35, %v765_v33  ;;  %v1394_v36 = vpop.f32.mrb[30].mxu1  ;;  %1435 = vmatprep.mubr.bf16.mxu0 %v880_v30 }
 0x1e0   : > { %v777_v37 = vadd.f32 %v1394_v36, %v1703_v35  ;;  %v768_v39 = vpop.f32.mrb[31].mxu1  ;;  %1436 = vmatmul.mubr.bf16.gmra.mrb[24].mxu0 %v881_v29  ;;  %v858_v41 = vmax.f32 %v774_v32, 0.0 }
 0x1e1   : > { %v769_v40 = vadd.f32 %v1703_v35, %v768_v39  ;;  %v856_v43 = vmax.f32 %v766_v34, 0.0 }
 0x1e2   : > { %v859_v42 = vmax.f32 %v777_v37, 0.0 }
 0x1e3   : > { %v857_v44 = vmax.f32 %v769_v40, 0.0  ;;  %v1740_v40 = vld [vmem:[%s1854_s6] ss:$0 sm:$0xff] }
 0x1e4   : > { %v883_v45 = vpack.c.bf16 %v859_v42, %v858_v41 }
 0x1e5   : > { %v882_v46 = vpack.c.bf16 %v857_v44, %v856_v43  ;;  %v1397_v47 = vpop.f32.mrb[32].mxu1 }
 0x1e6   : > { %v790_v48 = vadd.f32 %v1397_v47, %v1703_v35  ;;  %v781_v49 = vpop.f32.mrb[33].mxu1 }
 0x1e7   : > { %v782_v50 = vadd.f32 %v1703_v35, %v781_v49  ;;  %v1398_v51 = vpop.f32.mrb[34].mxu1  ;;  %1439 = vmatprep.mubr.bf16.mxu0 %v882_v46 }
 0x1e8   : > { %v793_v0 = vadd.f32 %v1398_v51, %v1703_v35  ;;  %v784_v38 = vpop.f32.mrb[35].mxu1  ;;  %1440 = vmatmul.mubr.bf16.gmra.mrb[28].mxu0 %v883_v45  ;;  %v862_v53 = vmax.f32 %v790_v48, 0.0 }
 0x1e9   : > { %v785_v52 = vadd.f32 %v1703_v35, %v784_v38  ;;  %v860_v55 = vmax.f32 %v782_v50, 0.0 }
 0x1ea   : > { %v863_v54 = vmax.f32 %v793_v0, 0.0 }
 0x1eb   : > { %v861_v56 = vmax.f32 %v785_v52, 0.0 }
 0x1ec   : > { %v885_v57 = vpack.c.bf16 %v863_v54, %v862_v53 }
 0x1ed   : > { %v884_v58 = vpack.c.bf16 %v861_v56, %v860_v55  ;;  %v1401_v59 = vpop.f32.mrb[36].mxu1 }
 0x1ee   : > { %v806_v60 = vadd.f32 %v1401_v59, %v1703_v35  ;;  %v797_v61 = vpop.f32.mrb[37].mxu1 }
 0x1ef   : > { %v798_v62 = vadd.f32 %v1703_v35, %v797_v61  ;;  %v1402_v63 = vpop.f32.mrb[38].mxu1  ;;  %1443 = vmatprep.mubr.bf16.mxu0 %v884_v58 }
 0x1f0   : > { %v809_v1 = vadd.f32 %v1402_v63, %v1703_v35  ;;  %v800_v2 = vpop.f32.mrb[39].mxu1  ;;  %1444 = vmatmul.mubr.bf16.gmra.mrb[32].mxu0 %v885_v57  ;;  %v866_v4 = vmax.f32 %v806_v60, 0.0 }
 0x1f1   : > { %v801_v3 = vadd.f32 %v1703_v35, %v800_v2  ;;  %v864_v6 = vmax.f32 %v798_v62, 0.0 }
 0x1f2   : > { %v867_v5 = vmax.f32 %v809_v1, 0.0 }
 0x1f3   : > { %v865_v7 = vmax.f32 %v801_v3, 0.0 }
 0x1f4   : > { %v887_v8 = vpack.c.bf16 %v867_v5, %v866_v4 }
 0x1f5   : > { %v886_v9 = vpack.c.bf16 %v865_v7, %v864_v6  ;;  %v1405_v10 = vpop.f32.mrb[40].mxu1 }
 0x1f6   : > { %v822_v11 = vadd.f32 %v1405_v10, %v1703_v35  ;;  %v813_v12 = vpop.f32.mrb[41].mxu1 }
 0x1f7   : > { %v814_v13 = vadd.f32 %v1703_v35, %v813_v12  ;;  %v1406_v14 = vpop.f32.mrb[42].mxu1  ;;  %1447 = vmatprep.mubr.bf16.mxu0 %v886_v9 }
 0x1f8   : > { %v825_v15 = vadd.f32 %v1406_v14, %v1703_v35  ;;  %v816_v16 = vpop.f32.mrb[43].mxu1  ;;  %1448 = vmatmul.mubr.bf16.gmra.mrb[36].mxu0 %v887_v8  ;;  %v870_v18 = vmax.f32 %v822_v11, 0.0 }
 0x1f9   : > { %v817_v17 = vadd.f32 %v1703_v35, %v816_v16  ;;  %v868_v20 = vmax.f32 %v814_v13, 0.0 }
 0x1fa   : > { %v871_v19 = vmax.f32 %v825_v15, 0.0 }
 0x1fb   : > { %v869_v21 = vmax.f32 %v817_v17, 0.0 }
 0x1fc   : > { %v889_v22 = vpack.c.bf16 %v871_v19, %v870_v18 }
 0x1fd   : > { %v888_v23 = vpack.c.bf16 %v869_v21, %v868_v20  ;;  %v1409_v24 = vpop.f32.mrb[44].mxu1 }
 0x1fe   : > { %v838_v25 = vadd.f32 %v1409_v24, %v1703_v35  ;;  %v829_v26 = vpop.f32.mrb[45].mxu1 }
 0x1ff   : > { %v830_v27 = vadd.f32 %v1703_v35, %v829_v26  ;;  %v1410_v28 = vpop.f32.mrb[46].mxu1  ;;  %1451 = vmatprep.mubr.bf16.mxu0 %v888_v23 }
 0x200   : > { %v841_v29 = vadd.f32 %v1410_v28, %v1703_v35  ;;  %v832_v30 = vpop.f32.mrb[47].mxu1  ;;  %1452 = vmatmul.mubr.bf16.gmra.mrb[40].mxu0 %v889_v22  ;;  %v874_v32 = vmax.f32 %v838_v25, 0.0 }
 0x201   : > { %v833_v31 = vadd.f32 %v1703_v35, %v832_v30  ;;  %v872_v34 = vmax.f32 %v830_v27, 0.0 }
 0x202   : > { %v875_v33 = vmax.f32 %v841_v29, 0.0 }
 0x203   : > { %v873_v36 = vmax.f32 %v833_v31, 0.0 }
 0x204   : > { %v891_v37 = vpack.c.bf16 %v875_v33, %v874_v32 }
 0x205   : > { %v890_v39 = vpack.c.bf16 %v873_v36, %v872_v34 }
 0x207   : > { %1455 = vmatprep.mubr.bf16.mxu0 %v890_v39 }
 0x208   : > { %1456 = vmatmul.mubr.bf16.gmra.mrb[44].mxu0 %v891_v37 }
 0x2a3   : > { %v1429_v35 = vpop.f32.mrb[16].mxu0 }
 0x2a4   : > { %v1006_v41 = vadd.f32 %v1429_v35, %v1740_v40  ;;  %v997_v42 = vpop.f32.mrb[17].mxu0 }
 0x2a5   : > { %v998_v43 = vadd.f32 %v1740_v40, %v997_v42  ;;  %v1430_v44 = vpop.f32.mrb[18].mxu0 }
 0x2a6   : > { %1127 = vst.msk [vmem:[%s1747_s12 + $0x10] sm:$0xff] %vm1124_vm1, %v1006_v41  ;;  %v1009_v45 = vadd.f32 %v1430_v44, %v1740_v40  ;;  %v1000_v46 = vpop.f32.mrb[19].mxu0 }
 0x2a7   : > { %1125 = vst.msk [vmem:[%s1747_s12] sm:$0xff] %vm1124_vm1, %v998_v43  ;;  %v1001_v47 = vadd.f32 %v1740_v40, %v1000_v46 }
 0x2a8   : > { %1128 = vst.msk [vmem:[%s1747_s12 + $0x18] sm:$0xff] %vm1124_vm1, %v1009_v45 }
 0x2a9   : > { %1126 = vst.msk [vmem:[%s1747_s12 + $0x8] sm:$0xff] %vm1124_vm1, %v1001_v47 }
 0x2ab   : > { %v1433_v48 = vpop.f32.mrb[20].mxu0 }
 0x2ac   : > { %v1022_v49 = vadd.f32 %v1433_v48, %v1740_v40  ;;  %v1013_v50 = vpop.f32.mrb[21].mxu0 }
 0x2ad   : > { %v1014_v51 = vadd.f32 %v1740_v40, %v1013_v50  ;;  %v1434_v0 = vpop.f32.mrb[22].mxu0 }
 0x2ae   : > { %1131 = vst.msk [vmem:[%s1747_s12 + $0x30] sm:$0xff] %vm1124_vm1, %v1022_v49  ;;  %v1025_v38 = vadd.f32 %v1434_v0, %v1740_v40  ;;  %v1016_v52 = vpop.f32.mrb[23].mxu0 }
 0x2af   : > { %1129 = vst.msk [vmem:[%s1747_s12 + $0x20] sm:$0xff] %vm1124_vm1, %v1014_v51  ;;  %v1017_v53 = vadd.f32 %v1740_v40, %v1016_v52 }
 0x2b0   : > { %1132 = vst.msk [vmem:[%s1747_s12 + $0x38] sm:$0xff] %vm1124_vm1, %v1025_v38 }
 0x2b1   : > { %1130 = vst.msk [vmem:[%s1747_s12 + $0x28] sm:$0xff] %vm1124_vm1, %v1017_v53 }
 0x2b3   : > { %v1437_v54 = vpop.f32.mrb[24].mxu0 }
 0x2b4   : > { %v1038_v55 = vadd.f32 %v1437_v54, %v1740_v40  ;;  %v1029_v56 = vpop.f32.mrb[25].mxu0 }
 0x2b5   : > { %v1030_v57 = vadd.f32 %v1740_v40, %v1029_v56  ;;  %v1438_v58 = vpop.f32.mrb[26].mxu0 }
 0x2b6   : > { %1135 = vst.msk [vmem:[%s1747_s12 + $0x50] sm:$0xff] %vm1124_vm1, %v1038_v55  ;;  %v1041_v59 = vadd.f32 %v1438_v58, %v1740_v40  ;;  %v1032_v60 = vpop.f32.mrb[27].mxu0 }
 0x2b7   : > { %1133 = vst.msk [vmem:[%s1747_s12 + $0x40] sm:$0xff] %vm1124_vm1, %v1030_v57  ;;  %v1033_v61 = vadd.f32 %v1740_v40, %v1032_v60 }
 0x2b8   : > { %1136 = vst.msk [vmem:[%s1747_s12 + $0x58] sm:$0xff] %vm1124_vm1, %v1041_v59 }
 0x2b9   : > { %1134 = vst.msk [vmem:[%s1747_s12 + $0x48] sm:$0xff] %vm1124_vm1, %v1033_v61 }
 0x2bb   : > { %v1441_v62 = vpop.f32.mrb[28].mxu0 }
 0x2bc   : > { %v1054_v63 = vadd.f32 %v1441_v62, %v1740_v40  ;;  %v1045_v1 = vpop.f32.mrb[29].mxu0 }
 0x2bd   : > { %v1046_v2 = vadd.f32 %v1740_v40, %v1045_v1  ;;  %v1442_v3 = vpop.f32.mrb[30].mxu0 }
 0x2be   : > { %1139 = vst.msk [vmem:[%s1747_s12 + $0x70] sm:$0xff] %vm1124_vm1, %v1054_v63  ;;  %v1057_v4 = vadd.f32 %v1442_v3, %v1740_v40  ;;  %v1048_v5 = vpop.f32.mrb[31].mxu0 }
 0x2bf   : > { %1137 = vst.msk [vmem:[%s1747_s12 + $0x60] sm:$0xff] %vm1124_vm1, %v1046_v2  ;;  %v1049_v6 = vadd.f32 %v1740_v40, %v1048_v5 }
 0x2c0   : > { %1140 = vst.msk [vmem:[%s1747_s12 + $0x78] sm:$0xff] %vm1124_vm1, %v1057_v4 }
 0x2c1   : > { %1138 = vst.msk [vmem:[%s1747_s12 + $0x68] sm:$0xff] %vm1124_vm1, %v1049_v6 }
 0x2c3   : > { %v1445_v7 = vpop.f32.mrb[32].mxu0 }
 0x2c4   : > { %v1070_v8 = vadd.f32 %v1445_v7, %v1740_v40  ;;  %v1061_v9 = vpop.f32.mrb[33].mxu0 }
 0x2c5   : > { %v1062_v10 = vadd.f32 %v1740_v40, %v1061_v9  ;;  %v1446_v11 = vpop.f32.mrb[34].mxu0 }
 0x2c6   : > { %1143 = vst.msk [vmem:[%s1747_s12 + $0x90] sm:$0xff] %vm1124_vm1, %v1070_v8  ;;  %v1073_v12 = vadd.f32 %v1446_v11, %v1740_v40  ;;  %v1064_v13 = vpop.f32.mrb[35].mxu0 }
 0x2c7   : > { %1141 = vst.msk [vmem:[%s1747_s12 + $0x80] sm:$0xff] %vm1124_vm1, %v1062_v10  ;;  %v1065_v14 = vadd.f32 %v1740_v40, %v1064_v13 }
 0x2c8   : > { %1144 = vst.msk [vmem:[%s1747_s12 + $0x98] sm:$0xff] %vm1124_vm1, %v1073_v12 }
 0x2c9   : > { %1142 = vst.msk [vmem:[%s1747_s12 + $0x88] sm:$0xff] %vm1124_vm1, %v1065_v14 }
 0x2cb   : > { %v1449_v15 = vpop.f32.mrb[36].mxu0 }
 0x2cc   : > { %v1086_v16 = vadd.f32 %v1449_v15, %v1740_v40  ;;  %v1077_v17 = vpop.f32.mrb[37].mxu0 }
 0x2cd   : > { %v1078_v18 = vadd.f32 %v1740_v40, %v1077_v17  ;;  %v1450_v19 = vpop.f32.mrb[38].mxu0 }
 0x2ce   : > { %1147 = vst.msk [vmem:[%s1747_s12 + $0xb0] sm:$0xff] %vm1124_vm1, %v1086_v16  ;;  %v1089_v20 = vadd.f32 %v1450_v19, %v1740_v40  ;;  %v1080_v21 = vpop.f32.mrb[39].mxu0 }
 0x2cf   : > { %1145 = vst.msk [vmem:[%s1747_s12 + $0xa0] sm:$0xff] %vm1124_vm1, %v1078_v18  ;;  %v1081_v22 = vadd.f32 %v1740_v40, %v1080_v21 }
 0x2d0   : > { %1148 = vst.msk [vmem:[%s1747_s12 + $0xb8] sm:$0xff] %vm1124_vm1, %v1089_v20 }
 0x2d1   : > { %1146 = vst.msk [vmem:[%s1747_s12 + $0xa8] sm:$0xff] %vm1124_vm1, %v1081_v22 }
 0x2d3   : > { %v1453_v23 = vpop.f32.mrb[40].mxu0 }
 0x2d4   : > { %v1102_v24 = vadd.f32 %v1453_v23, %v1740_v40  ;;  %v1093_v25 = vpop.f32.mrb[41].mxu0 }
 0x2d5   : > { %v1094_v26 = vadd.f32 %v1740_v40, %v1093_v25  ;;  %v1454_v27 = vpop.f32.mrb[42].mxu0 }
 0x2d6   : > { %1151 = vst.msk [vmem:[%s1747_s12 + $0xd0] sm:$0xff] %vm1124_vm1, %v1102_v24  ;;  %v1105_v28 = vadd.f32 %v1454_v27, %v1740_v40  ;;  %v1096_v29 = vpop.f32.mrb[43].mxu0 }
 0x2d7   : > { %1149 = vst.msk [vmem:[%s1747_s12 + $0xc0] sm:$0xff] %vm1124_vm1, %v1094_v26  ;;  %v1097_v30 = vadd.f32 %v1740_v40, %v1096_v29 }
 0x2d8   : > { %1152 = vst.msk [vmem:[%s1747_s12 + $0xd8] sm:$0xff] %vm1124_vm1, %v1105_v28 }
 0x2d9   : > { %1150 = vst.msk [vmem:[%s1747_s12 + $0xc8] sm:$0xff] %vm1124_vm1, %v1097_v30 }
 0x2db   : > { %v1457_v31 = vpop.f32.mrb[44].mxu0 }
 0x2dc   : > { %v1118_v32 = vadd.f32 %v1457_v31, %v1740_v40  ;;  %v1109_v33 = vpop.f32.mrb[45].mxu0 }
 0x2dd   : > { %v1110_v34 = vadd.f32 %v1740_v40, %v1109_v33  ;;  %v1458_v36 = vpop.f32.mrb[46].mxu0 }
 0x2de   : > { %1155 = vst.msk [vmem:[%s1747_s12 + $0xf0] sm:$0xff] %vm1124_vm1, %v1118_v32  ;;  %v1121_v37 = vadd.f32 %v1458_v36, %v1740_v40  ;;  %v1112_v39 = vpop.f32.mrb[47].mxu0 }
 0x2df   : > { %1153 = vst.msk [vmem:[%s1747_s12 + $0xe0] sm:$0xff] %vm1124_vm1, %v1110_v34  ;;  %v1113_v35 = vadd.f32 %v1740_v40, %v1112_v39 }
 0x2e0   : > { %1156 = vst.msk [vmem:[%s1747_s12 + $0xf8] sm:$0xff] %vm1124_vm1, %v1121_v37 }
 0x2e1   : > { %1154 = vst.msk [vmem:[%s1747_s12 + $0xe8] sm:$0xff] %vm1124_vm1, %v1113_v35 }
 0x2e2 PF: > { %s17_s24 = sadd.s32 1, %s1495_s24  }
 0x2e3   : > { %p14_p4 = scmp.ge.s32.totalorder %s17_s24, 4  }
 0x2e5   :  { %16 = sbr.rel (!%p14_p4) target bundleno = 1 (0x1), region = 78 }

</bundles_post_ra>
